<compile_context>
chip_gen: v7x
topology: tpu7x:2x2x1
jax: 0.10.0
libtpu: 0.0.40
codegen_flags: <defaults>
</compile_context>

<pallas_src>
import functools

import jax
import jax.numpy as jnp
from jax.experimental import pallas as pl
from jax.experimental.pallas import tpu as pltpu


# TODO(synk): ReSiLU is not defined in the provided snippet; implemented here as a
# hardness blend between sigmoid (soft, hardness=0 default) and a 0/1 step (hard).
def _resilu_ref(x, hardness: float):
    """Pure-JAX ReSiLU used for parameter folding and the reference path."""
    soft = jax.nn.sigmoid(x)
    if hardness == 0.0:
        return soft
    hard = (x > 0).astype(x.dtype)
    return (1.0 - hardness) * soft + hardness * hard


def popcnt_fused_kernel(x_ref, m_ref, b_ref, o_ref, *, hardness):
    # x_ref: (TB, IW)   m_ref: (IW, OW)   b_ref: (1, OW)   o_ref: (TB, OW)
    acc = jnp.dot(x_ref[...], m_ref[...], preferred_element_type=jnp.float32)
    z = acc - b_ref[...]
    # sigmoid via EUP approximate reciprocal (separate VLIW slot).
    soft = pl.reciprocal(1.0 + jnp.exp(-z), approx=True)
    if hardness == 0.0:  # static skip of the hard branch (default path)
        out = soft
    else:
        hard = (z > 0).astype(jnp.float32)
        out = (1.0 - hardness) * soft + hardness * hard
    o_ref[...] = out.astype(o_ref.dtype)


def popcnt_fold_params(input_selection, weights, biases, *, input_width, hardness=0.0):
    """Fold selection + weight activation + popcnt group-sum into a dense matrix.

    Call once per weight update (NOT per forward); depends only on parameters.
    Returns (M, b) with M: (input_width, output_width), b: (1, output_width).
    """
    assert isinstance(hardness, (int, float)), "hardness must be a static Python scalar"
    OW, PW = weights.shape
    rw = _resilu_ref(weights.astype(jnp.float32), float(hardness))    # (OW, PW)
    sel = input_selection.astype(jnp.int32)                           # (OW, PW)
    col = jnp.arange(OW, dtype=jnp.int32)[:, None]                    # (OW, 1)
    M = jnp.zeros((input_width, OW), jnp.float32).at[sel, col].add(rw)  # scatter-add
    b = biases.reshape(1, OW).astype(jnp.float32)
    return M, b


def _pick_batch_tile(B, batch_tile):
    """Large tiles to amortize per-step overhead; >=2 grid steps when possible (v7x)."""
    if B <= 8:
        return B
    tb = min(batch_tile, B)
    if pl.cdiv(B, tb) < 2 and B >= 16:
        tb = -(-B // 2)                      # split so both v7x TensorCores get work
    if tb != B:
        tb = max(8, -(-tb // 8) * 8)         # sublane-aligned tile
        tb = min(tb, B)
    return tb


def popcnt_layer_apply(x, M, b, *, hardness=0.0, batch_tile=4096):
    """Forward pass: out = resilu(x @ M - b).  x: (B, input_width), native dtype."""
    assert isinstance(hardness, (int, float)), "hardness must be a static Python scalar"
    B, IW = x.shape
    IWm, OW = M.shape
    assert IW == IWm, f"x last dim {IW} != folded matrix first dim {IWm}"

    TB = _pick_batch_tile(B, batch_tile)
    grid = (pl.cdiv(B, TB),)

    kernel = functools.partial(popcnt_fused_kernel, hardness=float(hardness))
    return pl.pallas_call(
        kernel,
        out_shape=jax.ShapeDtypeStruct((B, OW), jnp.float32),
        grid=grid,
        in_specs=[
            pl.BlockSpec((TB, IW), lambda i: (i, 0)),    # x tile (streams over batch)
            pl.BlockSpec((IW, OW), lambda i: (0, 0)),    # fused weight matrix (resident)
            pl.BlockSpec((1, OW), lambda i: (0, 0)),     # bias row (resident)
        ],
        out_specs=pl.BlockSpec((TB, OW), lambda i: (i, 0)),  # unpadded, lane dim = OW
        compiler_params=pltpu.CompilerParams(
            dimension_semantics=("parallel",)),          # megacore-shardable batch axis
    )(x, M, b)


def popcnt_layer(x, input_selection, weights, biases, *, hardness=0.0, batch_tile=4096):
    """Convenience wrapper (folds params then applies). Prefer caching the fold."""
    M, b = popcnt_fold_params(input_selection, weights, biases,
                              input_width=x.shape[1], hardness=hardness)
    return popcnt_layer_apply(x, M, b, hardness=hardness, batch_tile=batch_tile)


def popcnt_reference(x, input_selection, weights, biases, *, hardness=0.0):
    """Pure-JAX reference mirroring the PyTorch forward (un-fused order)."""
    B = x.shape[0]
    OW, PW = weights.shape
    selected = x[:, input_selection.reshape(-1)]
    weighted = selected * _resilu_ref(weights.reshape(-1), hardness)[None, :]
    summed = weighted.reshape(B, OW, PW).sum(-1)
    return _resilu_ref(summed - biases.reshape(-1), hardness)


if __name__ == "__main__":
    # Small shapes consistent with the module: PopcntLayer(input_width=32, output_width=16).
    input_width, output_width, popcnt_width = 32, 16, 64
    batch = 8

    key = jax.random.PRNGKey(0)
    k_sel, k_w, k_b, k_x = jax.random.split(key, 4)

    input_selection = jax.random.randint(
        k_sel, (output_width, popcnt_width), 0, input_width, dtype=jnp.int32)
    weights = jax.random.normal(k_w, (output_width, popcnt_width), dtype=jnp.float32)
    biases = (jax.random.normal(k_b, (output_width,), dtype=jnp.float32)
              * (popcnt_width / 3.0) + (popcnt_width / 4.0))

    x = jax.random.normal(k_x, (batch, input_width), dtype=jnp.float32)

    # Fold parameters once (per weight update), then run the single-matmul kernel.
    M, b = popcnt_fold_params(input_selection, weights, biases,
                              input_width=input_width, hardness=0.0)
    out = popcnt_layer_apply(x, M, b, hardness=0.0)
    out = jax.block_until_ready(out)

    ref = popcnt_reference(x, input_selection, weights, biases, hardness=0.0)
    assert out.shape == (batch, output_width)
    # Tolerance accounts for (a) the mathematically-identical reordering of the
    # popcnt-width sum in the fused x @ M form and (b) the EUP approximate
    # reciprocal used for the in-kernel sigmoid (outputs are in [0, 1]).
    assert jnp.allclose(out, ref, atol=2e-3, rtol=2e-3), "mismatch vs reference"

    print("KERNEL_OK")
</pallas_src>

<mosaic_0001>
module attributes {stable_mosaic.version = 11 : i64} {
  func.func @popcnt_fused_kernel(%arg0: i32, %arg1: memref<8x32xf32, #tpu.memory_space<vmem>>, %arg2: memref<32x16xf32, #tpu.memory_space<vmem>>, %arg3: memref<1x16xf32, #tpu.memory_space<vmem>>, %arg4: memref<8x16xf32, #tpu.memory_space<vmem>>) attributes {dimension_semantics = [#tpu.dimension_semantics<parallel>], iteration_bounds = array<i64: 1>, scalar_prefetch = 0 : i64, scratch_operands = 0 : i64, tpu.core_type = #tpu.core_type<tc>, window_params = [{transform_indices = @transform_0, window_bounds = array<i64: 8, 32>}, {pipeline_mode = #tpu.pipeline_mode<synchronous>, transform_indices = @transform_1, window_bounds = array<i64: 32, 16>}, {pipeline_mode = #tpu.pipeline_mode<synchronous>, transform_indices = @transform_2, window_bounds = array<i64: 1, 16>}, {transform_indices = @transform_3, window_bounds = array<i64: 8, 16>}]} {
    %c0 = arith.constant 0 : index
    %c0_0 = arith.constant 0 : index
    %0 = vector.load %arg1[%c0, %c0_0] : memref<8x32xf32, #tpu.memory_space<vmem>>, vector<8x32xf32>
    %c0_1 = arith.constant 0 : index
    %c0_2 = arith.constant 0 : index
    %1 = vector.load %arg2[%c0_1, %c0_2] : memref<32x16xf32, #tpu.memory_space<vmem>>, vector<32x16xf32>
    %cst = arith.constant dense<0.000000e+00> : vector<8x16xf32>
    %2 = tpu.matmul %0, %1, %cst {dimension_numbers = #tpu.dot_dimension_numbers<[1], [0], [0], [1], [0, 0, 1, 1], [], []>} : vector<8x32xf32>, vector<32x16xf32>, vector<8x16xf32> -> vector<8x16xf32>
    %c0_3 = arith.constant 0 : index
    %c0_4 = arith.constant 0 : index
    %3 = vector.load %arg3[%c0_3, %c0_4] : memref<1x16xf32, #tpu.memory_space<vmem>>, vector<1x16xf32>
    %4 = vector.broadcast %3 : vector<1x16xf32> to vector<8x16xf32>
    %5 = arith.subf %2, %4 : vector<8x16xf32>
    %cst_5 = arith.constant 0.000000e+00 : f32
    %6 = vector.broadcast %cst_5 : f32 to vector<8x16xf32>
    %7 = arith.subf %6, %5 : vector<8x16xf32>
    %8 = math.exp %7 : vector<8x16xf32>
    %cst_6 = arith.constant 1.000000e+00 : f32
    %9 = vector.broadcast %cst_6 : f32 to vector<8x16xf32>
    %10 = arith.addf %9, %8 : vector<8x16xf32>
    %11 = tpu.reciprocal %10 {approx = true} : vector<8x16xf32> -> vector<8x16xf32>
    %c0_7 = arith.constant 0 : index
    %c0_8 = arith.constant 0 : index
    %12 = vector.load %arg4[%c0_7, %c0_8] : memref<8x16xf32, #tpu.memory_space<vmem>>, vector<8x16xf32>
    tpu.vector_store %arg4[%c0_7, %c0_8], %11 {strides = array<i32>} : memref<8x16xf32, #tpu.memory_space<vmem>>, vector<8x16xf32>,
    return
  }
  func.func @transform_0(%arg0: i32) -> (i32, i32) {
    %c0_i32 = arith.constant 0 : i32
    %c0_i32_0 = arith.constant 0 : i32
    return %arg0, %c0_i32 : i32, i32
  }
  func.func @transform_1(%arg0: i32) -> (i32, i32) {
    %c0_i32 = arith.constant 0 : i32
    %c0_i32_0 = arith.constant 0 : i32
    %c0_i32_1 = arith.constant 0 : i32
    return %c0_i32, %c0_i32_0 : i32, i32
  }
  func.func @transform_2(%arg0: i32) -> (i32, i32) {
    %c0_i32 = arith.constant 0 : i32
    %c0_i32_0 = arith.constant 0 : i32
    %c0_i32_1 = arith.constant 0 : i32
    return %c0_i32, %c0_i32_0 : i32, i32
  }
  func.func @transform_3(%arg0: i32) -> (i32, i32) {
    %c0_i32 = arith.constant 0 : i32
    %c0_i32_0 = arith.constant 0 : i32
    return %arg0, %c0_i32 : i32, i32
  }
}

</mosaic_0001>

<bundles_post_ra>
// kernel: tpu_custom_call.1
= control target key start
LH: loop header
LB: loop body
LE: loop exit
PB: predicated region body
PF: predicated region fallthrough
CT: control target
= control target key end

     0   :  { %v179_v3 = vmov 0.0|0.0   ;;  %vm180_vm0 = vmmov 0   ;;  %v181_v6 = vmov 0.0   ;;  %s233_s0 = inlined_call_operand.vmem [shape: f32[8,32], index: 0, kind: input, shape index: {}]   ;;  %s234_s1 = inlined_call_operand.vmem [shape: f32[32,16], index: 1, kind: input, shape index: {}]   ;;  %s235_s2 = inlined_call_operand.vmem [shape: f32[1,16], index: 2, kind: input, shape index: {}]   ;;  %s236_s3 = inlined_call_operand.hbm [shape: f32[8,16], index: 3, kind: output, shape index: {}]  }
   0x1   :  { %v16_v0 = vld [vmem:[%s234_s1] sm:$0xff]  ;;  %v17_v1 = vld [vmem:[%s234_s1 + $0x8] sm:$0xff]  ;;  %v18_v2 = vld [vmem:[%s234_s1 + $0x10] sm:$0xff]  ;;  %141 = vmatprep.subr.bf16.mxu0 %v179_v3  ;;  %138 = vmatprep.mubr.msk.f32.mxu0 %vm180_vm0, %v181_v6 }
   0x2   :  { %v142_v4 = vpack.c.bf16 %v17_v1, %v16_v0  ;;  %v19_v5 = vld [vmem:[%s234_s1 + $0x18] sm:$0xff] }
   0x3   :  { %8 = vsyncpa [#allocation3], 0  ;;  %v145_v7 = vpack.c.bf16 %v19_v5, %v18_v2  ;;  %v15_v8 = vld [vmem:[%s233_s0] sm:$0xff]  ;;  %vm20_vm1 = vcmask 261120   ;;  %s182_s1 = smov [#allocation2]   ;;  %vm107_vm2 = vcmask 130048  }
   0x4   :  { %143 = vmatpush3.bf16.msra.mxu0 %v142_v4  ;;  %v124_v9 = vld [vmem:[%s235_s2] ss:$0 sm:$0xff]  ;;  %s115_s24 = sshll.u32 %s182_s1, 4  ;;  %s116_s24 = int_to_ptr.vmem [resolvable:$true] %s115_s24 }
   0x5   :  { %144 = vmatprep.subr.bf16.mxu0 %v179_v3  ;;  %s155_s0 = scalar_lea.vmem %s116_s24, 128  ;;  %p160_p1 = scmp.lt.s32.totalorder %s116_s24, %s116_s24 }
   0x6   :  { %p156_p0 = scmp.ne.s32.totalorder %s116_s24, %s155_s0  ;;  %p161_p2 = scmp.lt.s32.totalorder %s155_s0, %s155_s0 }
   0x8   :  { %146 = vmatpush3.bf16.msra.mxu0 %v145_v7  ;;  %p162_p3 = por %p161_p2, %p160_p1 }
   0xa   :  { %p163_p4 = pnand %p162_p3, %p156_p0 }
   0xb   :  { %139 = vmatmul.mubr.msk.f32.vlgmr.msra.gmra.mrb[0].mxu0 %vm20_vm1, %v15_v8 }
  0xde   :  { %v90_v10 = vpop.f32.mrb[0].mxu0 }
  0xdf   :  { %v101_v11 = vsub.f32 %v90_v10, %v124_v9  ;;  %v140_v12 = vpop.f32.mrb[1].mxu0 }
  0xe1   :  { %v102_v13 = vsub.f32 0.0, %v101_v11 }
  0xe3   :  { %v103_v14 = vmul.f32 1.442695, %v102_v13 }
  0xe5   :  { %151 = vpow2.f32 %v103_v14 }
  0xef   :  { %v152_v15 = vpop.eup %151 }
  0xf0   :  { %v105_v16 = vadd.f32 1.0, %v152_v15 }
  0xf2   :  { %153 = vrcp.f32 %v105_v16 }
  0xfc   :  { %v154_v17 = vpop.eup %153 }
  0xfd   :  { %108 = vst.msk [vmem:[#allocation2] sm:$0xff] %vm107_vm2, %v154_v17 }
  0xfe   :  { %166 = shalt.err (!%p163_p4)
}
  0xff   :  { %s167_s26 = scalar_lea.hbm %s236_s3, 128 }
 0x100   :  { %p168_p5 = scmp.ne.s32.totalorder %s236_s3, %s167_s26  ;;  %p171_p6 = scmp.lt.u32.totalorder %s167_s26, %s236_s3 }
 0x102   :  { %p173_p7 = pnand %p171_p6, %p168_p5 }
 0x104   :  { %176 = shalt.err (!%p173_p7)
}
 0x105   :  { %118 = dma.vmem_to_hbm [thread:$0]  %s116_s24, 128, %s236_s3, [#allocation3]  }
 0x106   :  { %177 = dma.done.wait [#allocation3], 128  }
 0x107   :  { %178 = vsyncadd [#allocation3], 4294967168 }
 0x108   :  { %122 = vsyncpa [#allocation3], 1 }

</bundles_post_ra>
